<compile_context>
chip_gen: v6e
topology: v6e:2x2x1
jax: 0.10.0
libtpu: 0.0.40
codegen_flags: <defaults>
</compile_context>

<pallas_src>
import jax
import jax.numpy as jnp
from jax.experimental import pallas as pl
from jax.experimental.pallas import tpu as pltpu

SUBLANE = 8            # f32 vreg sublane count
MAX_BATCH_TILE = 1024  # max batch rows per grid step (per-step VMEM ~100 KiB, far under budget)


def _round_up(x: int, m: int) -> int:
    return ((x + m - 1) // m) * m


def _choose_batch_tile(batch: int) -> int:
    """Largest tile <= MAX_BATCH_TILE; keep >= 2 grid steps for non-tiny batches so the
    auto-pipeline overlaps DMA with compute and v7x's two TensorCores both get work."""
    tb = min(MAX_BATCH_TILE, _round_up(batch, SUBLANE))
    if batch > 4 * SUBLANE and pl.cdiv(batch, tb) < 2:
        tb = _round_up(pl.cdiv(batch, 2), SUBLANE)
    return tb


def _policy_mlp_kernel(x_ref, w1_ref, b1_ref, w2_ref, b2_ref, w3_ref, b3_ref, out_ref):
    """Fused 3-layer MLP forward for one batch tile.

    x_ref:  [TB, OBS]      w1_ref: [OBS, H]   b1_ref: [1, H]
    w2_ref: [H, H]         b2_ref: [1, H]
    w3_ref: [H, A]         b3_ref: [1, A]
    out_ref:[TB, A]
    """
    x = x_ref[...]

    # Layer 1: Linear + Tanh (MXU matmul, EUP tanh).
    h1 = jnp.tanh(jnp.dot(x, w1_ref[...], preferred_element_type=jnp.float32) + b1_ref[...])

    # Layer 2: Linear + Tanh.
    h2 = jnp.tanh(jnp.dot(h1, w2_ref[...], preferred_element_type=jnp.float32) + b2_ref[...])

    # Layer 3: Linear (Identity activation) -> store at true num_actions width.
    logits = jnp.dot(h2, w3_ref[...], preferred_element_type=jnp.float32) + b3_ref[...]
    out_ref[...] = logits.astype(out_ref.dtype)


@jax.jit
def policy_forward(ob, params):
    """Policy forward pass via pallas_call.

    ob: [..., OBS] float. Leading dims are flattened into a batch, then restored.
    params: (w1, b1, w2, b2, w3, b3) with weights stored [in_features, out_features].
    """
    w1, b1, w2, b2, w3, b3 = params
    obs_size = w1.shape[0]
    num_actions = w3.shape[1]

    lead_shape = ob.shape[:-1]
    x = ob.reshape((-1, obs_size)).astype(jnp.float32)
    batch = x.shape[0]

    # Weights used as-is; only the biases get a trivial (1, N) reshape for 2-D VMEM blocks.
    w1f = w1.astype(jnp.float32)
    w2f = w2.astype(jnp.float32)
    w3f = w3.astype(jnp.float32)
    b1r = b1.reshape(1, -1).astype(jnp.float32)
    b2r = b2.reshape(1, -1).astype(jnp.float32)
    b3r = b3.reshape(1, -1).astype(jnp.float32)

    tb = _choose_batch_tile(batch)
    grid = (pl.cdiv(batch, tb),)

    def resident(arr):
        # Full-array block with constant index_map -> DMA'd once, VMEM-resident for the grid.
        return pl.BlockSpec(arr.shape, lambda i: (0, 0))

    out = pl.pallas_call(
        _policy_mlp_kernel,
        out_shape=jax.ShapeDtypeStruct((batch, num_actions), jnp.float32),
        grid_spec=pltpu.PrefetchScalarGridSpec(
            num_scalar_prefetch=0,
            grid=grid,
            in_specs=[
                pl.BlockSpec((tb, obs_size), lambda i: (i, 0)),  # x: tiled over batch
                resident(w1f), resident(b1r),
                resident(w2f), resident(b2r),
                resident(w3f), resident(b3r),
            ],
            out_specs=pl.BlockSpec((tb, num_actions), lambda i: (i, 0)),
        ),
        compiler_params=pltpu.CompilerParams(
            dimension_semantics=("parallel",),  # megacore split on v7x; no-op on v5e/v6e
        ),
    )(x, w1f, b1r, w2f, b2r, w3f, b3r)

    return out.reshape(lead_shape + (num_actions,))


def init_policy_params(key, observation_size, hidden_dim, num_actions):
    """Deterministic init mimicking PyTorch's default Linear init: U(-1/sqrt(fan_in), ...)."""
    keys = jax.random.split(key, 6)

    def linear(kw, kb, fan_in, fan_out):
        bound = 1.0 / jnp.sqrt(jnp.float32(fan_in))
        w = jax.random.uniform(kw, (fan_in, fan_out), jnp.float32, -bound, bound)
        b = jax.random.uniform(kb, (fan_out,), jnp.float32, -bound, bound)
        return w, b

    w1, b1 = linear(keys[0], keys[1], observation_size, hidden_dim)
    w2, b2 = linear(keys[2], keys[3], hidden_dim, hidden_dim)
    w3, b3 = linear(keys[4], keys[5], hidden_dim, num_actions)
    return (w1, b1, w2, b2, w3, b3)


def _reference_forward(ob, params):
    """Pure-JAX reference for correctness check."""
    w1, b1, w2, b2, w3, b3 = params
    h1 = jnp.tanh(ob @ w1 + b1)
    h2 = jnp.tanh(h1 @ w2 + b2)
    return h2 @ w3 + b3


if __name__ == "__main__":
    OBS_SIZE = 16      # observation_size
    HIDDEN = 32        # hidden_dim
    NUM_ACTIONS = 4    # num_actions
    BATCH = 8          # small demo batch

    key = jax.random.PRNGKey(0)
    k_params, k_ob, k_ob2 = jax.random.split(key, 3)

    params = init_policy_params(k_params, OBS_SIZE, HIDDEN, NUM_ACTIONS)

    # Small-batch check (single grid step).
    ob = jax.random.normal(k_ob, (BATCH, OBS_SIZE), dtype=jnp.float32)
    logits = policy_forward(ob, params)
    jax.block_until_ready(logits)
    ref = _reference_forward(ob, params)
    assert logits.shape == (BATCH, NUM_ACTIONS)
    assert jnp.allclose(logits, ref, atol=1e-5, rtol=1e-5)

    # Larger ragged batch: multi-step pipelined grid with a partial last tile
    # (exercises Pallas boundary read-padding / write-masking, no x copy, no output pad).
    ob2 = jax.random.normal(k_ob2, (515, OBS_SIZE), dtype=jnp.float32)
    logits2 = policy_forward(ob2, params)
    jax.block_until_ready(logits2)
    ref2 = _reference_forward(ob2, params)
    assert logits2.shape == (515, NUM_ACTIONS)
    assert jnp.allclose(logits2, ref2, atol=1e-5, rtol=1e-5)

    print("KERNEL_OK")
</pallas_src>

<mosaic_0001>
module attributes {stable_mosaic.version = 11 : i64} {
  func.func @_policy_mlp_kernel(%arg0: i32, %arg1: memref<8x16xf32, #tpu.memory_space<vmem>>, %arg2: memref<16x32xf32, #tpu.memory_space<vmem>>, %arg3: memref<1x32xf32, #tpu.memory_space<vmem>>, %arg4: memref<32x32xf32, #tpu.memory_space<vmem>>, %arg5: memref<1x32xf32, #tpu.memory_space<vmem>>, %arg6: memref<32x4xf32, #tpu.memory_space<vmem>>, %arg7: memref<1x4xf32, #tpu.memory_space<vmem>>, %arg8: memref<8x4xf32, #tpu.memory_space<vmem>>) attributes {dimension_semantics = [#tpu.dimension_semantics<parallel>], iteration_bounds = array<i64: 1>, scalar_prefetch = 0 : i64, scratch_operands = 0 : i64, tpu.core_type = #tpu.core_type<tc>, window_params = [{transform_indices = @transform_0, window_bounds = array<i64: 8, 16>}, {pipeline_mode = #tpu.pipeline_mode<synchronous>, transform_indices = @transform_1, window_bounds = array<i64: 16, 32>}, {pipeline_mode = #tpu.pipeline_mode<synchronous>, transform_indices = @transform_2, window_bounds = array<i64: 1, 32>}, {pipeline_mode = #tpu.pipeline_mode<synchronous>, transform_indices = @transform_3, window_bounds = array<i64: 32, 32>}, {pipeline_mode = #tpu.pipeline_mode<synchronous>, transform_indices = @transform_4, window_bounds = array<i64: 1, 32>}, {pipeline_mode = #tpu.pipeline_mode<synchronous>, transform_indices = @transform_5, window_bounds = array<i64: 32, 4>}, {pipeline_mode = #tpu.pipeline_mode<synchronous>, transform_indices = @transform_6, window_bounds = array<i64: 1, 4>}, {transform_indices = @transform_7, window_bounds = array<i64: 8, 4>}]} {
    %c0 = arith.constant 0 : index
    %c0_0 = arith.constant 0 : index
    %0 = vector.load %arg1[%c0, %c0_0] : memref<8x16xf32, #tpu.memory_space<vmem>>, vector<8x16xf32>
    %c0_1 = arith.constant 0 : index
    %c0_2 = arith.constant 0 : index
    %1 = vector.load %arg2[%c0_1, %c0_2] : memref<16x32xf32, #tpu.memory_space<vmem>>, vector<16x32xf32>
    %cst = arith.constant dense<0.000000e+00> : vector<8x32xf32>
    %2 = tpu.matmul %0, %1, %cst {dimension_numbers = #tpu.dot_dimension_numbers<[1], [0], [0], [1], [0, 0, 1, 1], [], []>} : vector<8x16xf32>, vector<16x32xf32>, vector<8x32xf32> -> vector<8x32xf32>
    %c0_3 = arith.constant 0 : index
    %c0_4 = arith.constant 0 : index
    %3 = vector.load %arg3[%c0_3, %c0_4] : memref<1x32xf32, #tpu.memory_space<vmem>>, vector<1x32xf32>
    %4 = vector.broadcast %3 : vector<1x32xf32> to vector<8x32xf32>
    %5 = arith.addf %2, %4 : vector<8x32xf32>
    %6 = math.tanh %5 : vector<8x32xf32>
    %c0_5 = arith.constant 0 : index
    %c0_6 = arith.constant 0 : index
    %7 = vector.load %arg4[%c0_5, %c0_6] : memref<32x32xf32, #tpu.memory_space<vmem>>, vector<32x32xf32>
    %cst_7 = arith.constant dense<0.000000e+00> : vector<8x32xf32>
    %8 = tpu.matmul %6, %7, %cst_7 {dimension_numbers = #tpu.dot_dimension_numbers<[1], [0], [0], [1], [0, 0, 1, 1], [], []>} : vector<8x32xf32>, vector<32x32xf32>, vector<8x32xf32> -> vector<8x32xf32>
    %c0_8 = arith.constant 0 : index
    %c0_9 = arith.constant 0 : index
    %9 = vector.load %arg5[%c0_8, %c0_9] : memref<1x32xf32, #tpu.memory_space<vmem>>, vector<1x32xf32>
    %10 = vector.broadcast %9 : vector<1x32xf32> to vector<8x32xf32>
    %11 = arith.addf %8, %10 : vector<8x32xf32>
    %12 = math.tanh %11 : vector<8x32xf32>
    %c0_10 = arith.constant 0 : index
    %c0_11 = arith.constant 0 : index
    %13 = vector.load %arg6[%c0_10, %c0_11] : memref<32x4xf32, #tpu.memory_space<vmem>>, vector<32x4xf32>
    %cst_12 = arith.constant dense<0.000000e+00> : vector<8x4xf32>
    %14 = tpu.matmul %12, %13, %cst_12 {dimension_numbers = #tpu.dot_dimension_numbers<[1], [0], [0], [1], [0, 0, 1, 1], [], []>} : vector<8x32xf32>, vector<32x4xf32>, vector<8x4xf32> -> vector<8x4xf32>
    %c0_13 = arith.constant 0 : index
    %c0_14 = arith.constant 0 : index
    %15 = vector.load %arg7[%c0_13, %c0_14] : memref<1x4xf32, #tpu.memory_space<vmem>>, vector<1x4xf32>
    %16 = vector.broadcast %15 : vector<1x4xf32> to vector<8x4xf32>
    %17 = arith.addf %14, %16 : vector<8x4xf32>
    %c0_15 = arith.constant 0 : index
    %c0_16 = arith.constant 0 : index
    %18 = vector.load %arg8[%c0_15, %c0_16] : memref<8x4xf32, #tpu.memory_space<vmem>>, vector<8x4xf32>
    tpu.vector_store %arg8[%c0_15, %c0_16], %17 {strides = array<i32>} : memref<8x4xf32, #tpu.memory_space<vmem>>, vector<8x4xf32>,
    return
  }
  func.func @transform_0(%arg0: i32) -> (i32, i32) {
    %c0_i32 = arith.constant 0 : i32
    %c0_i32_0 = arith.constant 0 : i32
    return %arg0, %c0_i32 : i32, i32
  }
  func.func @transform_1(%arg0: i32) -> (i32, i32) {
    %c0_i32 = arith.constant 0 : i32
    %c0_i32_0 = arith.constant 0 : i32
    %c0_i32_1 = arith.constant 0 : i32
    return %c0_i32, %c0_i32_0 : i32, i32
  }
  func.func @transform_2(%arg0: i32) -> (i32, i32) {
    %c0_i32 = arith.constant 0 : i32
    %c0_i32_0 = arith.constant 0 : i32
    %c0_i32_1 = arith.constant 0 : i32
    return %c0_i32, %c0_i32_0 : i32, i32
  }
  func.func @transform_3(%arg0: i32) -> (i32, i32) {
    %c0_i32 = arith.constant 0 : i32
    %c0_i32_0 = arith.constant 0 : i32
    %c0_i32_1 = arith.constant 0 : i32
    return %c0_i32, %c0_i32_0 : i32, i32
  }
  func.func @transform_4(%arg0: i32) -> (i32, i32) {
    %c0_i32 = arith.constant 0 : i32
    %c0_i32_0 = arith.constant 0 : i32
    %c0_i32_1 = arith.constant 0 : i32
    return %c0_i32, %c0_i32_0 : i32, i32
  }
  func.func @transform_5(%arg0: i32) -> (i32, i32) {
    %c0_i32 = arith.constant 0 : i32
    %c0_i32_0 = arith.constant 0 : i32
    %c0_i32_1 = arith.constant 0 : i32
    return %c0_i32, %c0_i32_0 : i32, i32
  }
  func.func @transform_6(%arg0: i32) -> (i32, i32) {
    %c0_i32 = arith.constant 0 : i32
    %c0_i32_0 = arith.constant 0 : i32
    %c0_i32_1 = arith.constant 0 : i32
    return %c0_i32, %c0_i32_0 : i32, i32
  }
  func.func @transform_7(%arg0: i32) -> (i32, i32) {
    %c0_i32 = arith.constant 0 : i32
    %c0_i32_0 = arith.constant 0 : i32
    return %arg0, %c0_i32 : i32, i32
  }
}

</mosaic_0001>

<bundles_post_ra>
// kernel: policy_forward.1
= control target key start
LH: loop header
LB: loop body
LE: loop exit
PB: predicated region body
PF: predicated region fallthrough
CT: control target
= control target key end

     0   :  { %12 = vsyncpa [#allocation3], 0  ;;  %s381_s24 = smov [#allocation2]   ;;  %s470_s0 = inlined_call_operand.vmem [shape: f32[8,16], index: 0, kind: input, shape index: {}]   ;;  %s471_s1 = inlined_call_operand.hbm [shape: f32[16,32], index: 1, kind: input, shape index: {}]   ;;  %s472_s2 = inlined_call_operand.vmem [shape: f32[1,32], index: 2, kind: input, shape index: {}]   ;;  %s473_s3 = inlined_call_operand.vmem [shape: f32[32,32], index: 3, kind: input, shape index: {}]   ;;  %s474_s4 = inlined_call_operand.vmem [shape: f32[1,32], index: 4, kind: input, shape index: {}]   ;;  %s475_s5 = inlined_call_operand.vmem [shape: f32[32,4], index: 5, kind: input, shape index: {}]   ;;  %s476_s6 = inlined_call_operand.vmem [shape: f32[1,4], index: 6, kind: input, shape index: {}]   ;;  %s477_s7 = inlined_call_operand.vmem [shape: f32[8,4], index: 7, kind: output, shape index: {}]  }
   0x1   :  { %s20_s25 = sshll.u32 %s381_s24, 4  ;;  %s21_s25 = int_to_ptr.vmem [resolvable:$true] %s20_s25 }
   0x2   :  { %s367_s26 = scalar_lea.vmem %s21_s25, 256  ;;  %p372_p1 = scmp.lt.s32.totalorder %s21_s25, %s21_s25 }
   0x3   :  { %p368_p0 = scmp.ne.s32.totalorder %s21_s25, %s367_s26  ;;  %p373_p2 = scmp.lt.s32.totalorder %s367_s26, %s367_s26 }
   0x5   :  { %p374_p3 = por %p373_p2, %p372_p1 }
   0x7   :  { %p375_p4 = pnand %p374_p3, %p368_p0 }
   0x9   :  { %378 = shalt.err (!%p375_p4)
}
   0xa   :  { %s382_s27 = smov 128   ;;  %s383_s28 = smov 8  }
   0xb   :  { %26 = dma.hbm_to_vmem [thread:$0]  %s471_s1, 256, %s21_s25, [#allocation3], %s382_s27, %s382_s27, %s383_s28  }
   0xc   :  { %379 = dma.done.wait [#allocation3], 256  }
   0xd   :  { %380 = vsyncadd [#allocation3], 4294967040  ;;  %v384_v0 = vmov 0.0   ;;  %vm385_vm0 = vmmov 0   ;;  %v42_v1 = vld [vmem:[#allocation2 + $0x8] sm:$0xff]  ;;  %v41_v2 = vld [vmem:[#allocation2] sm:$0xff] }
   0xe   :  { %321 = vmatprep.subr.mxu0 %v384_v0  ;;  %325 = vmatprep.mubr.msk.f32.mxu0 %vm385_vm0, %v384_v0  ;;  %v40_v3 = vld [vmem:[%s470_s0] sm:$0xff]  ;;  %vm50_vm1 = vcmask 130048   ;;  %v128_v4 = vld [vmem:[%s473_s3 + $0x18] sm:$0xff]  ;;  %v127_v5 = vld [vmem:[%s473_s3 + $0x10] sm:$0xff]  ;;  %vm136_vm2 = vcmask 261120   ;;  %vm295_vm3 = vcmask 31744  }
   0xf   :  { %328 = vmatprep.subr.mxu1 %v384_v0  ;;  %336 = vmatprep.mubr.msk.f32.mxu1 %vm385_vm0, %v384_v0  ;;  %v126_v6 = vld [vmem:[%s473_s3 + $0x8] sm:$0xff]  ;;  %v125_v7 = vld [vmem:[%s473_s3] sm:$0xff]  ;;  %v214_v13 = vld [vmem:[%s475_s5 + $0x18] sm:$0xff] }
  0x10   :  { %322 = vmatpush3.msra.mxu0 %v42_v1  ;;  %329 = vmatpush3.msra.mxu1 %v128_v4  ;;  %v302_v8 = vld [vmem:[%s472_s2] ss:$0 sm:$0xff]  ;;  %v213_v14 = vld [vmem:[%s475_s5 + $0x10] sm:$0xff]  ;;  %v212_v15 = vld [vmem:[%s475_s5 + $0x8] sm:$0xff] }
  0x11   :  { %323 = vmatprep.subr.mxu0 %v384_v0  ;;  %330 = vmatprep.subr.mxu1 %v384_v0  ;;  %v211_v16 = vld [vmem:[%s475_s5] sm:$0xff] }
  0x12   :  { %324 = vmatpush3.msra.mxu0 %v41_v2  ;;  %331 = vmatpush3.msra.mxu1 %v127_v5  ;;  %v304_v17 = vld [vmem:[%s474_s4] ss:$0 sm:$0xff] }
  0x13   :  { %326 = vmatmul.mubr.msk.f32.vlgmr.msra.gmra.mxu0 %vm50_vm1, %v40_v3  ;;  %339 = vmatprep.subr.mxu0 %v384_v0  ;;  %v306_v22 = vld [vmem:[%s476_s6] ss:$0 sm:$0xff] }
  0x14   :  { %347 = vmatprep.mubr.msk.f32.mxu0 %vm385_vm0, %v384_v0  ;;  %332 = vmatprep.subr.mxu1 %v384_v0 }
  0x15   :  { %333 = vmatpush3.msra.mxu1 %v126_v6  ;;  %340 = vmatpush3.msra.mxu0 %v214_v13 }
  0x16   :  { %334 = vmatprep.subr.mxu1 %v384_v0  ;;  %341 = vmatprep.subr.mxu0 %v384_v0 }
  0x17   :  { %335 = vmatpush3.msra.mxu1 %v125_v7  ;;  %342 = vmatpush3.msra.mxu0 %v213_v14 }
  0x18   :  { %343 = vmatprep.subr.mxu0 %v384_v0 }
  0x19   :  { %344 = vmatpush3.msra.mxu0 %v212_v15 }
  0x1a   :  { %345 = vmatprep.subr.mxu0 %v384_v0 }
  0x1b   :  { %346 = vmatpush3.msra.mxu0 %v211_v16 }
  0xd3   :  { %v120_v9 = vpop.f32.mrf.mxu0 }
  0xd4   :  { %v121_v10 = vadd.f32 %v302_v8, %v120_v9 }
  0xd5   :  { %v327_v11 = vpop.f32.mrf.mxu0 }
  0xd6   :  { %355 = vtanh.f32 %v121_v10 }
  0xe3   :  { %v356_v12 = vpop.eup %355 }
  0xe4   :  { %337 = vmatmul.mubr.msk.f32.vlgmr.msra.gmra.mxu1 %vm136_vm2, %v356_v12 }
 0x1a4   :  { %v206_v18 = vpop.f32.mrf.mxu1 }
 0x1a5   :  { %v207_v19 = vadd.f32 %v304_v17, %v206_v18 }
 0x1a6   :  { %v338_v20 = vpop.f32.mrf.mxu1 }
 0x1a7   :  { %357 = vtanh.f32 %v207_v19 }
 0x1b4   :  { %v358_v21 = vpop.eup %357 }
 0x1b5   :  { %348 = vmatmul.mubr.msk.f32.vlgmr.msra.gmra.mxu0 %vm136_vm2, %v358_v21 }
 0x275   :  { %v291_v23 = vpop.f32.mrf.mxu0 }
 0x276   :  { %v292_v24 = vadd.f32 %v306_v22, %v291_v23 }
 0x277   :  { %v349_v25 = vpop.f32.mrf.mxu0 }
 0x278   :  { %296 = vst.msk [vmem:[%s477_s7] sm:$0xff] %vm295_vm3, %v292_v24 }
 0x279   :  { %301 = vsyncpa [#allocation3], 1 }

</bundles_post_ra>
